<compile_context>
chip_gen: v5e
topology: v5e:2x2
jax: 0.10.0
libtpu: 0.0.40
codegen_flags: <defaults>
</compile_context>

<pallas_src>
import functools
import math

import jax
import jax.numpy as jnp
from jax import lax
from jax.experimental import pallas as pl
from jax.experimental.pallas import tpu as pltpu


_VMEM_LIMIT = 48 * 1024 * 1024   # < 64 MiB physical on v7x, plenty everywhere


# ----------------------------------------------------------------------------
# Pallas kernels
# ----------------------------------------------------------------------------
def matmul_kernel(x_ref, w_ref, o_ref, acc_ref):
    """Y = X @ W, accumulated over the K grid axis (bf16 in, f32 acc/out)."""
    @pl.when(pl.program_id(2) == 0)
    def _():
        acc_ref[...] = jnp.zeros_like(acc_ref)

    acc_ref[...] += jnp.dot(x_ref[...], w_ref[...],
                            preferred_element_type=jnp.float32)

    @pl.when(pl.program_id(2) == pl.num_programs(2) - 1)
    def _():
        o_ref[...] = acc_ref[...]


def matmul_bias_kernel(x_ref, w_ref, b_ref, o_ref, acc_ref):
    """Y = X @ W + b (detection head only)."""
    @pl.when(pl.program_id(2) == 0)
    def _():
        acc_ref[...] = jnp.zeros_like(acc_ref)

    acc_ref[...] += jnp.dot(x_ref[...], w_ref[...],
                            preferred_element_type=jnp.float32)

    @pl.when(pl.program_id(2) == pl.num_programs(2) - 1)
    def _():
        o_ref[...] = acc_ref[...] + b_ref[...]        # (tm,tn) + (1,tn)


def bn_leaky_kernel(y_ref, g_ref, b_ref, o_ref, *, slope, eps):
    """Training-mode BatchNorm (batch stats, biased var) + LeakyReLU(slope).

    Single pass over the (M, tc) tile: sum + sum-of-squares, then one FMA per
    element with precomputed per-channel scale/shift.
    """
    y = y_ref[...]                                    # (M, tc) f32
    inv_m = 1.0 / y.shape[0]
    s1 = jnp.sum(y, axis=0, keepdims=True)
    s2 = jnp.sum(y * y, axis=0, keepdims=True)
    mean = s1 * inv_m
    var = jnp.maximum(s2 * inv_m - mean * mean, 0.0)
    scale = g_ref[...] * lax.rsqrt(var + eps)
    shift = b_ref[...] - mean * scale
    z = y * scale + shift
    o_ref[...] = jnp.where(z > 0, z, slope * z).astype(o_ref.dtype)


def bn_leaky_add_kernel(y_ref, g_ref, b_ref, skip_ref, o_ref, *, slope, eps):
    """Same as bn_leaky_kernel but with the residual skip add fused in."""
    y = y_ref[...]
    inv_m = 1.0 / y.shape[0]
    s1 = jnp.sum(y, axis=0, keepdims=True)
    s2 = jnp.sum(y * y, axis=0, keepdims=True)
    mean = s1 * inv_m
    var = jnp.maximum(s2 * inv_m - mean * mean, 0.0)
    scale = g_ref[...] * lax.rsqrt(var + eps)
    shift = b_ref[...] - mean * scale
    z = y * scale + shift
    act = jnp.where(z > 0, z, slope * z)
    o_ref[...] = (act + skip_ref[...].astype(jnp.float32)).astype(o_ref.dtype)


# ----------------------------------------------------------------------------
# Pallas wrappers
# ----------------------------------------------------------------------------
def _round_up(x, m):
    return (x + m - 1) // m * m


def _pick_tile(dim, candidates):
    """Largest candidate that tiles `dim`; else fall back to the full dim."""
    for c in candidates:
        if c <= dim and dim % c == 0:
            return c
    return dim   # full-dim block (exempt from the (8,128) divisibility rule)


def pallas_matmul(x, w, bias=None):
    """x:(M,K) bf16 @ w:(K,Np) bf16 [+ bias:(Np,) f32] -> (M,Np) f32."""
    M, K = x.shape
    Kw, Np = w.shape
    assert K == Kw and Np % 128 == 0
    Kp = _round_up(K, 128)
    if Kp != K:                               # only the very first conv (K=27)
        x = jnp.pad(x, ((0, 0), (0, Kp - K)))
        w = jnp.pad(w, ((0, Kp - K), (0, 0)))

    small_m = M <= 128
    tm = _pick_tile(M, (256, 128))
    tn = _pick_tile(Np, (1024, 512, 384, 256, 128) if small_m else (256, 128))
    tk = _pick_tile(Kp, (1024, 512, 384, 256, 128) if small_m
                    else (512, 384, 256, 128))
    grid = (M // tm, Np // tn, Kp // tk)

    in_specs = [pl.BlockSpec((tm, tk), lambda i, j, k: (i, k)),
                pl.BlockSpec((tk, tn), lambda i, j, k: (k, j))]
    args = [x, w]
    if bias is None:
        kernel = matmul_kernel
    else:
        kernel = matmul_bias_kernel
        in_specs.append(pl.BlockSpec((1, tn), lambda i, j, k: (0, j)))
        args.append(bias.reshape(1, Np).astype(jnp.float32))

    return pl.pallas_call(
        kernel,
        out_shape=jax.ShapeDtypeStruct((M, Np), jnp.float32),
        grid_spec=pltpu.PrefetchScalarGridSpec(
            num_scalar_prefetch=0,
            grid=grid,
            in_specs=in_specs,
            out_specs=pl.BlockSpec((tm, tn), lambda i, j, k: (i, j)),
            scratch_shapes=[pltpu.VMEM((tm, tn), jnp.float32)],
        ),
        compiler_params=pltpu.CompilerParams(
            dimension_semantics=("parallel", "parallel", "arbitrary"),
            vmem_limit_bytes=_VMEM_LIMIT,
        ),
    )(*args)


def pallas_bn_leaky(y, gamma, beta, skip=None, slope=0.1, eps=1e-5):
    """y:(M,Np) f32 conv output; gamma/beta:(Np,) f32; skip:(M,Np) bf16 or None.

    Returns (M, Np) bf16 = LeakyReLU(BN(y)) [+ skip].
    """
    M, Np = y.shape
    # Widest channel tile keeping the f32 input block <= 4 MiB.
    tc = 128
    for c in (1024, 512, 256, 128):
        if Np % c == 0 and M * c <= (1 << 20):
            tc = c
            break

    gp = gamma.reshape(1, Np)
    bp = beta.reshape(1, Np)

    in_specs = [pl.BlockSpec((M, tc), lambda j: (0, j)),
                pl.BlockSpec((1, tc), lambda j: (0, j)),
                pl.BlockSpec((1, tc), lambda j: (0, j))]
    args = [y, gp, bp]
    if skip is None:
        kernel = functools.partial(bn_leaky_kernel, slope=slope, eps=eps)
    else:
        kernel = functools.partial(bn_leaky_add_kernel, slope=slope, eps=eps)
        in_specs.append(pl.BlockSpec((M, tc), lambda j: (0, j)))
        args.append(skip)

    return pl.pallas_call(
        kernel,
        out_shape=jax.ShapeDtypeStruct((M, Np), jnp.bfloat16),
        grid_spec=pltpu.PrefetchScalarGridSpec(
            num_scalar_prefetch=0,
            grid=(Np // tc,),
            in_specs=in_specs,
            out_specs=pl.BlockSpec((M, tc), lambda j: (0, j)),
        ),
        compiler_params=pltpu.CompilerParams(
            dimension_semantics=("parallel",),
            vmem_limit_bytes=_VMEM_LIMIT,
        ),
    )(*args)


# ----------------------------------------------------------------------------
# im2col (data movement only) and conv building blocks
# ----------------------------------------------------------------------------
def im2col(x, k, stride, pad):
    """x: NHWC (bf16) -> (N*Ho*Wo, k*k*C) with (kh, kw, cin) column order."""
    N, H, W, C = x.shape
    if k == 1 and stride == 1 and pad == 0:
        return x.reshape(N * H * W, C), (N, H, W)
    xp = jnp.pad(x, ((0, 0), (pad, pad), (pad, pad), (0, 0)))
    Ho = (H + 2 * pad - k) // stride + 1
    Wo = (W + 2 * pad - k) // stride + 1
    cols = [xp[:, i:i + stride * (Ho - 1) + 1:stride,
               j:j + stride * (Wo - 1) + 1:stride, :]
            for i in range(k) for j in range(k)]
    X = jnp.concatenate(cols, axis=-1)          # (N, Ho, Wo, k*k*C)
    return X.reshape(N * Ho * Wo, k * k * C), (N, Ho, Wo)


def conv_bn_leaky(x, p, skip=None):
    """ConvolutionalLayer: Conv2d(no bias) + BatchNorm2d + LeakyReLU(0.1).

    Channels stay padded to a multiple of 128; padded channels are exactly zero
    through the matmul (zero weight rows/cols), BN (gamma=beta=0) and the skip.
    """
    X, (N, Ho, Wo) = im2col(x, p["k"], p["s"], p["p"])
    Y = pallas_matmul(X, p["wm"])                         # (M, cout_p) f32
    skip2d = None if skip is None else skip.reshape(-1, p["cout_p"])
    Z = pallas_bn_leaky(Y, p["gamma"], p["beta"], skip=skip2d)
    return Z.reshape(N, Ho, Wo, p["cout_p"])              # bf16


def conv_plain(x, p):
    """Detection head final Conv2d (1x1, with bias, no BN, no activation)."""
    X, (N, Ho, Wo) = im2col(x, p["k"], p["s"], p["p"])
    Y = pallas_matmul(X, p["wm"], bias=p["b"])            # (M, cout_p) f32
    return Y[:, :p["cout"]].reshape(N, Ho, Wo, p["cout"])


def upsample2x(x):  # nearest-neighbor, NHWC
    return jnp.repeat(jnp.repeat(x, 2, axis=1), 2, axis=2)


# ----------------------------------------------------------------------------
# Deterministic parameter construction (mirrors the PyTorch module structure)
# ----------------------------------------------------------------------------
class KeyGen:
    def __init__(self, key):
        self.key = key
        self.i = 0

    def __call__(self):
        self.i += 1
        return jax.random.fold_in(self.key, self.i)


def init_conv(kg, cin, cout, k, s, pad, cin_p=None):
    """Conv+BN+LeakyReLU params, weight pre-padded/reshaped to matmul layout."""
    fan = cin * k * k
    w = jax.random.normal(kg(), (k, k, cin, cout), jnp.float32) / math.sqrt(fan)
    cin_p = _round_up(cin, 128) if cin_p is None else cin_p
    cout_p = _round_up(cout, 128)
    wp = jnp.pad(w, ((0, 0), (0, 0), (0, cin_p - cin), (0, cout_p - cout)))
    return dict(
        wm=wp.reshape(k * k * cin_p, cout_p).astype(jnp.bfloat16),
        gamma=jnp.pad(jnp.ones((cout,), jnp.float32), (0, cout_p - cout)),
        beta=jnp.zeros((cout_p,), jnp.float32),
        k=k, s=s, p=pad, cout_p=cout_p)


def init_plain(kg, cin, cout):  # 1x1 conv with bias (detection head tail)
    w = jax.random.normal(kg(), (1, 1, cin, cout), jnp.float32) / math.sqrt(cin)
    b = 0.01 * jax.random.normal(kg(), (cout,), jnp.float32)
    cin_p = _round_up(cin, 128)
    cout_p = _round_up(cout, 128)
    wp = jnp.pad(w, ((0, 0), (0, 0), (0, cin_p - cin), (0, cout_p - cout)))
    return dict(
        wm=wp.reshape(cin_p, cout_p).astype(jnp.bfloat16),
        b=jnp.pad(b, (0, cout_p - cout)),
        k=1, s=1, p=0, cout=cout, cout_p=cout_p)


def init_residual(kg, c):
    return [init_conv(kg, c, c // 2, 1, 1, 0), init_conv(kg, c // 2, c, 3, 1, 1)]


def init_convset(kg, cin, cout):
    return [init_conv(kg, cin, cout, 1, 1, 0),
            init_conv(kg, cout, cin, 3, 1, 1),
            init_conv(kg, cin, cout, 1, 1, 0),
            init_conv(kg, cout, cin, 3, 1, 1),
            init_conv(kg, cin, cout, 1, 1, 0)]


def init_mainnet(kg):
    p = {}
    p["trunk_52"] = (
        [("conv", init_conv(kg, 3, 32, 3, 1, 1, cin_p=3)),   # raw 3-ch input
         ("conv", init_conv(kg, 32, 64, 3, 2, 1)),
         ("res", init_residual(kg, 64)),
         ("conv", init_conv(kg, 64, 128, 3, 2, 1)),
         ("res", init_residual(kg, 128)),
         ("res", init_residual(kg, 128)),
         ("conv", init_conv(kg, 128, 256, 3, 2, 1))]
        + [("res", init_residual(kg, 256)) for _ in range(8)])
    p["trunk_26"] = ([("conv", init_conv(kg, 256, 512, 3, 2, 1))]
                     + [("res", init_residual(kg, 512)) for _ in range(8)])
    p["trunk_13"] = ([("conv", init_conv(kg, 512, 1024, 3, 2, 1))]
                     + [("res", init_residual(kg, 1024)) for _ in range(4)])
    p["convset_13"] = init_convset(kg, 1024, 512)
    p["up_26"] = init_conv(kg, 512, 256, 1, 1, 0)
    p["convset_26"] = init_convset(kg, 768, 256)
    p["up_52"] = init_conv(kg, 256, 128, 1, 1, 0)
    p["convset_52"] = init_convset(kg, 384, 128)
    p["det_13"] = [init_conv(kg, 512, 1024, 3, 1, 1), init_plain(kg, 1024, 45)]
    p["det_26"] = [init_conv(kg, 256, 512, 3, 1, 1), init_plain(kg, 512, 45)]
    p["det_52"] = [init_conv(kg, 128, 256, 3, 1, 1), init_plain(kg, 256, 45)]
    return p


# ----------------------------------------------------------------------------
# Forward pass
# ----------------------------------------------------------------------------
def apply_residual(x, ps):
    y = conv_bn_leaky(x, ps[0])
    return conv_bn_leaky(y, ps[1], skip=x)     # residual add fused in BN kernel


def apply_trunk(x, blocks):
    for kind, bp in blocks:
        x = conv_bn_leaky(x, bp) if kind == "conv" else apply_residual(x, bp)
    return x


def apply_convset(x, ps):
    for bp in ps:
        x = conv_bn_leaky(x, bp)
    return x


def mainnet_forward(params, x_nchw):
    x = jnp.transpose(x_nchw, (0, 2, 3, 1)).astype(jnp.bfloat16)   # NCHW->NHWC

    h_52 = apply_trunk(x, params["trunk_52"])
    h_26 = apply_trunk(h_52, params["trunk_26"])
    h_13 = apply_trunk(h_26, params["trunk_13"])

    cs13 = apply_convset(h_13, params["convset_13"])
    up26 = upsample2x(conv_bn_leaky(cs13, params["up_26"]))
    route26 = jnp.concatenate([up26, h_26], axis=-1)
    cs26 = apply_convset(route26, params["convset_26"])
    up52 = upsample2x(conv_bn_leaky(cs26, params["up_52"]))
    route52 = jnp.concatenate([up52, h_52], axis=-1)
    cs52 = apply_convset(route52, params["convset_52"])

    d13 = conv_plain(conv_bn_leaky(cs13, params["det_13"][0]), params["det_13"][1])
    d26 = conv_plain(conv_bn_leaky(cs26, params["det_26"][0]), params["det_26"][1])
    d52 = conv_plain(conv_bn_leaky(cs52, params["det_52"][0]), params["det_52"][1])

    # back to NCHW to match PyTorch output convention (f32)
    return tuple(jnp.transpose(d, (0, 3, 1, 2)) for d in (d13, d26, d52))


# ----------------------------------------------------------------------------
if __name__ == "__main__":
    key = jax.random.PRNGKey(0)
    x = jax.random.normal(jax.random.fold_in(key, 12345), (2, 3, 64, 64),
                          dtype=jnp.float32)          # NCHW, small input

    params = init_mainnet(KeyGen(key))
    d13, d26, d52 = mainnet_forward(params, x)
    jax.block_until_ready((d13, d26, d52))

    assert d13.shape == (2, 45, 2, 2), d13.shape
    assert d26.shape == (2, 45, 4, 4), d26.shape
    assert d52.shape == (2, 45, 8, 8), d52.shape
    assert all(bool(jnp.isfinite(o).all()) for o in (d13, d26, d52))

    print("KERNEL_OK")
</pallas_src>

<mosaic_0001>
module attributes {stable_mosaic.version = 11 : i64} {
  func.func @matmul_kernel(%arg0: i32, %arg1: i32, %arg2: i32, %arg3: memref<256x128xbf16, #tpu.memory_space<vmem>>, %arg4: memref<128x128xbf16, #tpu.memory_space<vmem>>, %arg5: memref<256x128xf32, #tpu.memory_space<vmem>>, %arg6: memref<256x128xf32, #tpu.memory_space<vmem>>) attributes {dimension_semantics = [#tpu.dimension_semantics<parallel>, #tpu.dimension_semantics<parallel>, #tpu.dimension_semantics<arbitrary>], iteration_bounds = array<i64: 32, 1, 1>, scalar_prefetch = 0 : i64, scratch_operands = 1 : i64, tpu.core_type = #tpu.core_type<tc>, window_params = [{transform_indices = @transform_0, window_bounds = array<i64: 256, 128>}, {transform_indices = @transform_1, window_bounds = array<i64: 128, 128>}, {transform_indices = @transform_2, window_bounds = array<i64: 256, 128>}]} {
    %c0_i32 = arith.constant 0 : i32
    %0 = arith.cmpi eq, %arg2, %c0_i32 : i32
    %1 = arith.extui %0 : i1 to i32
    %c0_i32_0 = arith.constant 0 : i32
    %2 = arith.cmpi ne, %1, %c0_i32_0 : i32
    scf.if %2 {
      %cst_10 = arith.constant 0.000000e+00 : f32
      %12 = vector.broadcast %cst_10 : f32 to vector<256x128xf32>
      %c0_11 = arith.constant 0 : index
      %c0_12 = arith.constant 0 : index
      %13 = vector.load %arg6[%c0_11, %c0_12] : memref<256x128xf32, #tpu.memory_space<vmem>>, vector<256x128xf32>
      tpu.vector_store %arg6[%c0_11, %c0_12], %12 {strides = array<i32>} : memref<256x128xf32, #tpu.memory_space<vmem>>, vector<256x128xf32>,
    } else {
    }
    %c0 = arith.constant 0 : index
    %c0_1 = arith.constant 0 : index
    %3 = vector.load %arg6[%c0, %c0_1] : memref<256x128xf32, #tpu.memory_space<vmem>>, vector<256x128xf32>
    %c0_2 = arith.constant 0 : index
    %c0_3 = arith.constant 0 : index
    %4 = vector.load %arg3[%c0_2, %c0_3] : memref<256x128xbf16, #tpu.memory_space<vmem>>, vector<256x128xbf16>
    %c0_4 = arith.constant 0 : index
    %c0_5 = arith.constant 0 : index
    %5 = vector.load %arg4[%c0_4, %c0_5] : memref<128x128xbf16, #tpu.memory_space<vmem>>, vector<128x128xbf16>
    %cst = arith.constant dense<0.000000e+00> : vector<256x128xf32>
    %6 = tpu.matmul %4, %5, %cst {dimension_numbers = #tpu.dot_dimension_numbers<[1], [0], [0], [1], [0, 0, 1, 1], [], []>} : vector<256x128xbf16>, vector<128x128xbf16>, vector<256x128xf32> -> vector<256x128xf32>
    %7 = arith.addf %3, %6 : vector<256x128xf32>
    %c0_6 = arith.constant 0 : index
    %c0_7 = arith.constant 0 : index
    %8 = vector.load %arg6[%c0_6, %c0_7] : memref<256x128xf32, #tpu.memory_space<vmem>>, vector<256x128xf32>
    tpu.vector_store %arg6[%c0_6, %c0_7], %7 {strides = array<i32>} : memref<256x128xf32, #tpu.memory_space<vmem>>, vector<256x128xf32>,
    %c0_i32_8 = arith.constant 0 : i32
    %9 = arith.cmpi eq, %arg2, %c0_i32_8 : i32
    %10 = arith.extui %9 : i1 to i32
    %c0_i32_9 = arith.constant 0 : i32
    %11 = arith.cmpi ne, %10, %c0_i32_9 : i32
    scf.if %11 {
      %c0_10 = arith.constant 0 : index
      %c0_11 = arith.constant 0 : index
      %12 = vector.load %arg6[%c0_10, %c0_11] : memref<256x128xf32, #tpu.memory_space<vmem>>, vector<256x128xf32>
      %c0_12 = arith.constant 0 : index
      %c0_13 = arith.constant 0 : index
      %13 = vector.load %arg5[%c0_12, %c0_13] : memref<256x128xf32, #tpu.memory_space<vmem>>, vector<256x128xf32>
      tpu.vector_store %arg5[%c0_12, %c0_13], %12 {strides = array<i32>} : memref<256x128xf32, #tpu.memory_space<vmem>>, vector<256x128xf32>,
    } else {
    }
    return
  }
  func.func @transform_0(%arg0: i32, %arg1: i32, %arg2: i32) -> (i32, i32) {
    %c0_i32 = arith.constant 0 : i32
    return %arg0, %arg2 : i32, i32
  }
  func.func @transform_1(%arg0: i32, %arg1: i32, %arg2: i32) -> (i32, i32) {
    %c0_i32 = arith.constant 0 : i32
    return %arg2, %arg1 : i32, i32
  }
  func.func @transform_2(%arg0: i32, %arg1: i32, %arg2: i32) -> (i32, i32) {
    %c0_i32 = arith.constant 0 : i32
    return %arg0, %arg1 : i32, i32
  }
}

</mosaic_0001>

<bundles_post_ra>
// kernel: tpu_custom_call.1
= control target key start
LH: loop header
LB: loop body
LE: loop exit
PB: predicated region body
PF: predicated region fallthrough
CT: control target
= control target key end

     0   :  { %7 = vsyncpa [#allocation4], 0  ;;  %s1433_s0 = inlined_call_operand.hbm [shape: bf16[8192,128], index: 0, kind: input, shape index: {}]   ;;  %s1434_s1 = inlined_call_operand.hbm [shape: bf16[128,128], index: 1, kind: input, shape index: {}]   ;;  %s1435_s2 = inlined_call_operand.hbm [shape: f32[8192,128], index: 2, kind: output, shape index: {}]  }
   0x1   :  { %9 = vsyncpa [#allocation4 + $0x1], 0 }
   0x2   :  { %10 = vsyncpa [#allocation7], 0 }
   0x3   :  { %11 = vsyncpa [#allocation5], 0 }
   0x4   :  { %13 = vsyncpa [#allocation5 + $0x1], 0  ;;  %s1226_s9 = smov 0   ;;  %s1228_s10 = smov 0  }
   0x5   :  { %s1230_s11 = smov 0   ;;  %s1232_s12 = smov 0  }
   0x6   :  { %s1234_s13 = smov 0   ;;  %s1236_s14 = smov 0  }
   0x7 LB: > { %s818_s15 = sadd.s32 4294967295, %s1204_s14   ;;  %s819_s16 = sadd.s32 4294967294, %s1204_s14   ;;  %s1204_s14 = sphi %s1236_s14, %s19_s14   ;;  %s1200_s13 = sphi %s1234_s13, %s1447_s13   ;;  %s1196_s12 = sphi %s1232_s12, %s1446_s12   ;;  %s1192_s11 = sphi %s1230_s11, %s1445_s11   ;;  %s1188_s10 = sphi %s1228_s10, %s1444_s10   ;;  %s1184_s9 = sphi %s1226_s9, %s1443_s9  }
   0x8   : > { %p60_p0 = scmp.ne.s32.totalorder %s1188_s10, %s1184_s9  ;;  %p1260_p1 = scmp.eq.s32.totalorder %s818_s15, 0 }
   0x9   : > { %p1264_p2 = scmp.eq.s32.totalorder %s818_s15, 31  ;;  %p120_p3 = scmp.eq.s32.totalorder %s819_s16, 31 }
   0xa   : > { %p1270_p4 = por %p1260_p1, %p60_p0  ;;  %p820_p5 = scmp.ge.s32.totalorder %s1204_s14, 1 }
   0xb   : > { %p1275_p6 = por %p120_p3, %p60_p0  ;;  %p127_p7 = scmp.lt.s32.totalorder %s1204_s14, 33 }
   0xc   : > { %s142_s23 = sshll.u32 %s1434_s1, 4  ;;  %s1206_s25 = smov [#allocation6]   ;;  %s143_s23 = int_to_ptr.hbm [resolvable:$true] %s142_s23 }
   0xd   : > { %p1283_p8 = pnand %p820_p5, %p127_p7  ;;  %s144_s26 = sshll.u32 %s1206_s25, 4  ;;  %s145_s26 = int_to_ptr.vmem [resolvable:$true] %s144_s26 }
   0xe   : > { %s1207_s27 = smov 64   ;;  %s1208_s28 = smov 4  }
   0xf   : > { %p989_p9 = pneg %p1283_p8  ;;  %s38_s29 = sadd.s32 1, %s1200_s13 }
  0x10   : > { %p40_p11 = scmp.ge.s32.totalorder %s38_s29, 32  ;;  %s47_s30 = sadd.s32 1, %s1192_s11 }
  0x11   : > { %p990_p10 = pnand %p989_p9, %p1260_p1  ;;  %p54_p12 = scmp.ne.s32.totalorder %s1192_s11, %s1188_s10 }
  0x12   : > { %p55_p13 = scmp.eq.s32.totalorder %s1204_s14, 0  ;;  %s1449_s29 = smov (%p40_p11, %s38_s29), 0 }
  0x13   : > { %992 = dma.hbm_to_vmem [thread:$0]  (!%p990_p10), %s143_s23, 1024, %s145_s26, [#allocation7], %s1207_s27, %s1207_s27, %s1208_s28  }
  0x14   : > { %p1301_p0 = por %p55_p13, %p54_p12  ;;  %p1307_p3 = por %p1264_p2, %p54_p12 }
  0x15   : > { %s42_s5 = ssub.s32 %s1200_s13, %s1449_s29  ;;  %p1002_p5 = scmp.lt.s32.totalorder %s1204_s14, 32 }
  0x16   : > { %p45_p7 = scmp.eq.s32.totalorder %s42_s5, 0  ;;  %s158_s6 = sand.u32 1, %s1192_s11  }
  0x17   : > { %s823_s7 = sshll.u32 %s158_s6, 7  ;;  %s931_s15 = sshll.u32 %s1200_s13, 7 }
  0x18   : > { %s1316_s8 = scalar_select %p45_p7, %s1192_s11, %s47_s30  }
  0x19   : > { %s168_s22 = scalar_lea.hbm %s1433_s0, %s931_s15  ;;  %s162_s23 = scalar_lea.vmem [#allocation3], %s823_s7 }
  0x1a   : > { %s171_s25 = sshll.u32 %s162_s23, 4  ;;  %s169_s18 = sshll.u32 %s168_s22, 4  ;;  %s172_s25 = int_to_ptr.vmem [resolvable:$true] %s171_s25  ;;  %s170_s18 = int_to_ptr.hbm [resolvable:$true] %s169_s18 }
  0x1b   : > { %p994_p2 = pnand %p1002_p5, %p1301_p0  ;;  %s159_s26 = scalar_lea.sflag [#allocation4], %s158_s6 }
  0x1c   : > { %183 = sbr.rel (%p1283_p8) target bundleno = 262 (0x106), region = 28  ;;  %s1330_s30 = sand.u32 (!%p1283_p8), 1, %s1188_s10  }
  0x1d   : > { %996 = dma.hbm_to_vmem [thread:$0]  (!%p994_p2), %s170_s18, 2048, %s172_s25, %s159_s26, %s1207_s27, %s1207_s27, %s1208_s28  }
  0x1e   : > { %s827_s5 = sshll.u32 (!%p1283_p8), %s1330_s30, 7  ;;  %s186_s7 = scalar_lea.sflag (!%p1283_p8), [#allocation4], %s1330_s30 }
  0x1f   : > { %s1334_s15 = scalar_lea.vmem (!%p1283_p8), [#allocation3], %s827_s5 }
  0x21   : > { %1171 = dma.done.wait (%p1270_p4), %s186_s7, 2048  }
  0x22   : > { %1173 = vsyncadd (%p1270_p4), %s186_s7, 4294965248 }
  0x23   : > { %1175 = dma.done.wait (%p1260_p1), [#allocation7], 1024  }
  0x24   : > { %1177 = vsyncadd (%p1260_p1), [#allocation7], 4294966272  ;;  %v955_v0 = vld [vmem:[#allocation6 + $0x38] sm:$0xff]  ;;  %v954_v1 = vld [vmem:[#allocation6 + $0x30] sm:$0xff]  ;;  %s829_s17 = sshll.u32 %s1330_s30, 8  ;;  %s956_s24 = sshll.u32 %s1196_s12, 8 }
  0x25   : > { %479 = vmatpush.bf16.msra.mxu0 %v955_v0  ;;  %957 = vmatpush.bf16.msra.mxu1 %v955_v0  ;;  %v953_v2 = vld [vmem:[#allocation6 + $0x28] sm:$0xff]  ;;  %v952_v3 = vld [vmem:[#allocation6 + $0x20] sm:$0xff]  ;;  %v951_v4 = vld [vmem:[#allocation6 + $0x18] sm:$0xff]  ;;  %s1361_s19 = scalar_lea.vmem [#allocation8], %s829_s17  ;;  %s712_s3 = scalar_lea.hbm %s1435_s2, %s956_s24 }
  0x26   : > { %958 = vmatpush.bf16.msra.mxu2 %v955_v0  ;;  %959 = vmatpush.bf16.msra.mxu3 %v955_v0  ;;  %v950_v5 = vld [vmem:[#allocation6 + $0x10] sm:$0xff]  ;;  %v949_v6 = vld [vmem:[#allocation6 + $0x8] sm:$0xff]  ;;  %v948_v7 = vld [vmem:[#allocation6] sm:$0xff]  ;;  %s713_s6 = sshll.u32 %s1361_s19, 4  ;;  %s715_s16 = sshll.u32 %s712_s3, 4  ;;  %s714_s6 = int_to_ptr.vmem [resolvable:$true] %s713_s6  ;;  %s716_s16 = int_to_ptr.hbm [resolvable:$true] %s715_s16 }
  0x27   : > { %v932_v8 = vld [vmem:[%s1334_s15] sm:$0xff]  ;;  %v933_v12 = vld [vmem:[%s1334_s15 + $0x8] sm:$0xff]  ;;  %v934_v16 = vld [vmem:[%s1334_s15 + $0x10] sm:$0xff]  ;;  %s700_s12 = scalar_lea.sflag [#allocation5], %s1330_s30  ;;  %s1132_s21 = sshra.s32 %s716_s16, 4  ;;  %s1133_s21 = int_to_ptr.hbm [resolvable:$true] %s1132_s21 }
  0x28   : > { %v936_v9 = vld [vmem:[%s1334_s15 + $0x20] sm:$0xff]  ;;  %v937_v13 = vld [vmem:[%s1334_s15 + $0x28] sm:$0xff]  ;;  %v938_v17 = vld [vmem:[%s1334_s15 + $0x30] sm:$0xff]  ;;  %s1134_s22 = scalar_lea.hbm %s1133_s21, 256  ;;  %s1138_s18 = scalar_lea.hbm %s1435_s2, 8192 }
  0x29   : > { %480 = vmatpush.bf16.msra.mxu0 %v954_v1  ;;  %960 = vmatpush.bf16.msra.mxu1 %v954_v1  ;;  %v940_v10 = vld [vmem:[%s1334_s15 + $0x40] sm:$0xff]  ;;  %v941_v14 = vld [vmem:[%s1334_s15 + $0x48] sm:$0xff]  ;;  %v942_v18 = vld [vmem:[%s1334_s15 + $0x50] sm:$0xff]  ;;  %p1135_p1 = scmp.ne.s32.totalorder %s1133_s21, %s1134_s22  ;;  %p1139_p9 = scmp.lt.s32.totalorder %s1133_s21, %s1435_s2 }
  0x2a   : > { %961 = vmatpush.bf16.msra.mxu2 %v954_v1  ;;  %962 = vmatpush.bf16.msra.mxu3 %v954_v1  ;;  %v944_v11 = vld [vmem:[%s1334_s15 + $0x60] sm:$0xff]  ;;  %v945_v15 = vld [vmem:[%s1334_s15 + $0x68] sm:$0xff]  ;;  %v946_v19 = vld [vmem:[%s1334_s15 + $0x70] sm:$0xff]  ;;  %p1140_p10 = scmp.lt.s32.totalorder %s1138_s18, %s1134_s22 }
  0x2b   : > { %v935_v20 = vld [vmem:[%s1334_s15 + $0x18] sm:$0xff]  ;;  %p1136_p4 = pnand %p1135_p1, %p1307_p3 }
  0x2c   : > { %v939_v21 = vld [vmem:[%s1334_s15 + $0x38] sm:$0xff]  ;;  %p1141_p11 = por %p1140_p10, %p1139_p9 }
  0x2d   : > { %481 = vmatpush.bf16.msra.mxu0 %v953_v2  ;;  %963 = vmatpush.bf16.msra.mxu1 %v953_v2  ;;  %v943_v22 = vld [vmem:[%s1334_s15 + $0x58] sm:$0xff]  ;;  %p1137_p8 = pneg %p1136_p4 }
  0x2e   : > { %964 = vmatpush.bf16.msra.mxu2 %v953_v2  ;;  %965 = vmatpush.bf16.msra.mxu3 %v953_v2  ;;  %v947_v23 = vld [vmem:[%s1334_s15 + $0x78] sm:$0xff] }
  0x2f   : > { %p1142_p12 = pnand %p1141_p11, %p1137_p8 }
  0x31   : > { %482 = vmatpush.bf16.msra.mxu0 %v952_v3  ;;  %966 = vmatpush.bf16.msra.mxu1 %v952_v3 }
  0x32   : > { %967 = vmatpush.bf16.msra.mxu2 %v952_v3  ;;  %968 = vmatpush.bf16.msra.mxu3 %v952_v3 }
  0x35   : > { %483 = vmatpush.bf16.msra.mxu0 %v951_v4  ;;  %969 = vmatpush.bf16.msra.mxu1 %v951_v4 }
  0x36   : > { %970 = vmatpush.bf16.msra.mxu2 %v951_v4  ;;  %971 = vmatpush.bf16.msra.mxu3 %v951_v4 }
  0x39   : > { %484 = vmatpush.bf16.msra.mxu0 %v950_v5  ;;  %972 = vmatpush.bf16.msra.mxu1 %v950_v5 }
  0x3a   : > { %973 = vmatpush.bf16.msra.mxu2 %v950_v5  ;;  %974 = vmatpush.bf16.msra.mxu3 %v950_v5 }
  0x3d   : > { %485 = vmatpush.bf16.msra.mxu0 %v949_v6  ;;  %975 = vmatpush.bf16.msra.mxu1 %v949_v6 }
  0x3e   : > { %976 = vmatpush.bf16.msra.mxu2 %v949_v6  ;;  %977 = vmatpush.bf16.msra.mxu3 %v949_v6 }
  0x41   : > { %486 = vmatpush.bf16.msra.mxu0 %v948_v7  ;;  %978 = vmatpush.bf16.msra.mxu1 %v948_v7 }
  0x42   : > { %979 = vmatpush.bf16.msra.mxu2 %v948_v7  ;;  %980 = vmatpush.bf16.msra.mxu3 %v948_v7 }
  0x44   : > { %487 = vmatmul.bf16.vlgmr.msra.gmra.mxu0 %v932_v8  ;;  %507 = vmatmul.bf16.vlgmr.msra.gmra.mxu1 %v936_v9 }
  0x45   : > { %527 = vmatmul.bf16.vlgmr.msra.gmra.mxu2 %v940_v10  ;;  %547 = vmatmul.bf16.vlgmr.msra.gmra.mxu3 %v944_v11 }
  0x54   : > { %492 = vmatmul.bf16.gmra.mxu0 %v933_v12  ;;  %512 = vmatmul.bf16.gmra.mxu1 %v937_v13 }
  0x55   : > { %532 = vmatmul.bf16.gmra.mxu2 %v941_v14  ;;  %552 = vmatmul.bf16.gmra.mxu3 %v945_v15 }
  0x64   : > { %497 = vmatmul.bf16.gmra.mxu0 %v934_v16  ;;  %517 = vmatmul.bf16.gmra.mxu1 %v938_v17 }
  0x65   : > { %537 = vmatmul.bf16.gmra.mxu2 %v942_v18  ;;  %557 = vmatmul.bf16.gmra.mxu3 %v946_v19 }
  0x74   : > { %502 = vmatmul.bf16.gmra.mxu0 %v935_v20  ;;  %522 = vmatmul.bf16.gmra.mxu1 %v939_v21 }
  0x75   : > { %542 = vmatmul.bf16.gmra.mxu2 %v943_v22  ;;  %562 = vmatmul.bf16.gmra.mxu3 %v947_v23 }
  0xc1   : > { %v488_v24 = vpop.f32.mrf.mxu0  ;;  %v508_v25 = vpop.f32.mrf.mxu1 }
  0xc2   : > { %667 = vst [vmem:[%s1361_s19] sm:$0xff] %v488_v24 }
  0xc3   : > { %675 = vst [vmem:[%s1361_s19 + $0x40] sm:$0xff] %v508_v25 }
  0xc8   : > { %v528_v26 = vpop.f32.mrf.mxu2  ;;  %v548_v27 = vpop.f32.mrf.mxu3 }
  0xc9   : > { %683 = vst [vmem:[%s1361_s19 + $0x80] sm:$0xff] %v528_v26  ;;  %v490_v28 = vpop.f32.mrf.mxu0  ;;  %v510_v29 = vpop.f32.mrf.mxu1 }
  0xca   : > { %691 = vst [vmem:[%s1361_s19 + $0xc0] sm:$0xff] %v548_v27 }
  0xcb   : > { %668 = vst [vmem:[%s1361_s19 + $0x8] sm:$0xff] %v490_v28 }
  0xcc   : > { %676 = vst [vmem:[%s1361_s19 + $0x48] sm:$0xff] %v510_v29 }
  0xd0   : > { %v530_v30 = vpop.f32.mrf.mxu2  ;;  %v550_v31 = vpop.f32.mrf.mxu3 }
  0xd1   : > { %684 = vst [vmem:[%s1361_s19 + $0x88] sm:$0xff] %v530_v30  ;;  %v493_v32 = vpop.f32.mrf.mxu0  ;;  %v513_v33 = vpop.f32.mrf.mxu1 }
  0xd2   : > { %692 = vst [vmem:[%s1361_s19 + $0xc8] sm:$0xff] %v550_v31 }
  0xd3   : > { %669 = vst [vmem:[%s1361_s19 + $0x10] sm:$0xff] %v493_v32 }
  0xd4   : > { %677 = vst [vmem:[%s1361_s19 + $0x50] sm:$0xff] %v513_v33 }
  0xd8   : > { %v533_v34 = vpop.f32.mrf.mxu2  ;;  %v553_v35 = vpop.f32.mrf.mxu3 }
  0xd9   : > { %685 = vst [vmem:[%s1361_s19 + $0x90] sm:$0xff] %v533_v34  ;;  %v495_v36 = vpop.f32.mrf.mxu0  ;;  %v515_v37 = vpop.f32.mrf.mxu1 }
  0xda   : > { %693 = vst [vmem:[%s1361_s19 + $0xd0] sm:$0xff] %v553_v35 }
  0xdb   : > { %670 = vst [vmem:[%s1361_s19 + $0x18] sm:$0xff] %v495_v36 }
  0xdc   : > { %678 = vst [vmem:[%s1361_s19 + $0x58] sm:$0xff] %v515_v37 }
  0xe0   : > { %v535_v38 = vpop.f32.mrf.mxu2  ;;  %v555_v39 = vpop.f32.mrf.mxu3 }
  0xe1   : > { %686 = vst [vmem:[%s1361_s19 + $0x98] sm:$0xff] %v535_v38  ;;  %v498_v40 = vpop.f32.mrf.mxu0  ;;  %v518_v41 = vpop.f32.mrf.mxu1 }
  0xe2   : > { %694 = vst [vmem:[%s1361_s19 + $0xd8] sm:$0xff] %v555_v39 }
  0xe3   : > { %671 = vst [vmem:[%s1361_s19 + $0x20] sm:$0xff] %v498_v40 }
  0xe4   : > { %679 = vst [vmem:[%s1361_s19 + $0x60] sm:$0xff] %v518_v41 }
  0xe8   : > { %v538_v42 = vpop.f32.mrf.mxu2  ;;  %v558_v43 = vpop.f32.mrf.mxu3 }
  0xe9   : > { %687 = vst [vmem:[%s1361_s19 + $0xa0] sm:$0xff] %v538_v42  ;;  %v500_v44 = vpop.f32.mrf.mxu0  ;;  %v520_v45 = vpop.f32.mrf.mxu1 }
  0xea   : > { %695 = vst [vmem:[%s1361_s19 + $0xe0] sm:$0xff] %v558_v43 }
  0xeb   : > { %672 = vst [vmem:[%s1361_s19 + $0x28] sm:$0xff] %v500_v44 }
  0xec   : > { %680 = vst [vmem:[%s1361_s19 + $0x68] sm:$0xff] %v520_v45 }
  0xf0   : > { %v540_v46 = vpop.f32.mrf.mxu2  ;;  %v560_v47 = vpop.f32.mrf.mxu3 }
  0xf1   : > { %688 = vst [vmem:[%s1361_s19 + $0xa8] sm:$0xff] %v540_v46  ;;  %v503_v48 = vpop.f32.mrf.mxu0  ;;  %v523_v49 = vpop.f32.mrf.mxu1 }
  0xf2   : > { %696 = vst [vmem:[%s1361_s19 + $0xe8] sm:$0xff] %v560_v47 }
  0xf3   : > { %673 = vst [vmem:[%s1361_s19 + $0x30] sm:$0xff] %v503_v48 }
  0xf4   : > { %681 = vst [vmem:[%s1361_s19 + $0x70] sm:$0xff] %v523_v49 }
  0xf8   : > { %v543_v50 = vpop.f32.mrf.mxu2  ;;  %v563_v51 = vpop.f32.mrf.mxu3 }
  0xf9   : > { %689 = vst [vmem:[%s1361_s19 + $0xb0] sm:$0xff] %v543_v50  ;;  %v505_v52 = vpop.f32.mrf.mxu0  ;;  %v525_v53 = vpop.f32.mrf.mxu1 }
  0xfa   : > { %697 = vst [vmem:[%s1361_s19 + $0xf0] sm:$0xff] %v563_v51 }
  0xfb   : > { %674 = vst [vmem:[%s1361_s19 + $0x38] sm:$0xff] %v505_v52 }
  0xfc   : > { %682 = vst [vmem:[%s1361_s19 + $0x78] sm:$0xff] %v525_v53 }
 0x100   : > { %v545_v54 = vpop.f32.mrf.mxu2  ;;  %v565_v55 = vpop.f32.mrf.mxu3 }
 0x101   : > { %690 = vst [vmem:[%s1361_s19 + $0xb8] sm:$0xff] %v545_v54 }
 0x102   : > { %698 = vst [vmem:[%s1361_s19 + $0xf8] sm:$0xff] %v565_v55 }
 0x103   : > { %1145 = shalt.err (!%p1142_p12)
}
 0x104   : > { %s1209_s30 = smov 128   ;;  %s1210_s7 = smov 8  }
 0x105   : > { %987 = dma.vmem_to_hbm [thread:$0]  (%p1307_p3), %s714_s6, 4096, %s716_s16, %s700_s12, %s1209_s30, %s1209_s30, %s1210_s7  }
 0x106 PF: > { %p1004_p13 = scmp.ge.s32.totalorder %s1204_s14, 2  ;;  %s730_s15 = sand.u32 1, %s1184_s9  }
 0x107   : > { %s731_s17 = scalar_lea.sflag [#allocation5], %s730_s15 }
 0x108   : > { %p998_p0 = pnand %p1004_p13, %p1275_p6 }
 0x10a   : > { %p999_p5 = pneg %p998_p0 }
 0x10c   : > { %1179 = dma.done.wait (%p999_p5), %s731_s17, 4096  }
 0x10d   : > { %1181 = vsyncadd (%p999_p5), %s731_s17, 4294963200  ;;  %s19_s14 = sadd.s32 1, %s1204_s14   ;;  %s1443_s9 = smov %s1188_s10 }
 0x10e   : > { %p16_p7 = scmp.ge.s32.totalorder %s19_s14, 34   ;;  %s1444_s10 = smov %s1192_s11 }
 0x10f   : > { %s1445_s11 = smov %s1316_s8  ;;  %s1446_s12 = smov %s1200_s13 }
 0x110   : > { %s1447_s13 = smov %s1449_s29  ;;  %18 = sbr.rel (!%p16_p7) target bundleno = 7 (0x7), region = 86 }
 0x115   :  { %737 = vsyncpa [#allocation4], 1 }
 0x116   :  { %739 = vsyncpa [#allocation4 + $0x1], 1 }
 0x117   :  { %740 = vsyncpa [#allocation7], 1 }
 0x118   :  { %741 = vsyncpa [#allocation5], 1 }
 0x119   :  { %743 = vsyncpa [#allocation5 + $0x1], 1 }

</bundles_post_ra>
